<compile_context>
chip_gen: v7x
topology: tpu7x:2x2x1
jax: 0.10.0
libtpu: 0.0.40
codegen_flags: <defaults>
</compile_context>

<pallas_src>
import functools
import math

import jax
import jax.numpy as jnp
from jax import lax
from jax.experimental import pallas as pl
from jax.experimental.pallas import tpu as pltpu


# --------------------------------------------------------------------------- helpers

def _vmem_limit_bytes():
    """Generation-aware VMEM budget: 3/4 of physical VMEM, v7x-safe fallback."""
    try:
        cap = int(pltpu.get_tpu_info().vmem_capacity_bytes)
    except Exception:
        cap = 64 * 1024 * 1024          # conservative: v7x physical VMEM per TC
    return int(cap * 3 // 4)


def _choose_block(n, candidates=(512, 256, 128)):
    for c in candidates:
        if n % c == 0:
            return c
    return n


# --------------------------------------------------------------------------- stage 1

def _qkv_proj_kernel(x_ref, w_ref, o_ref):
    # (ts, E) @ (E, 3E) -> (ts, 3E): bf16 MXU inputs, f32 accumulation, bf16 store.
    o_ref[...] = jnp.dot(x_ref[...], w_ref[...],
                         preferred_element_type=jnp.float32).astype(o_ref.dtype)


def _qkv_projection(x_bf16, w_qkv_t, *, s_block, vmem_limit):
    N, S, E = x_bf16.shape
    three_e = w_qkv_t.shape[1]
    num_s = S // s_block
    return pl.pallas_call(
        _qkv_proj_kernel,
        out_shape=jax.ShapeDtypeStruct((N, S, three_e), jnp.bfloat16),
        grid_spec=pltpu.PrefetchScalarGridSpec(
            num_scalar_prefetch=0,
            grid=(num_s, N),            # seq axis leading: better 2-TC split at small N
            in_specs=[
                pl.BlockSpec((pl.Squeezed(), s_block, E), lambda si, b: (b, si, 0)),
                pl.BlockSpec((E, three_e), lambda si, b: (0, 0)),
            ],
            out_specs=pl.BlockSpec((pl.Squeezed(), s_block, three_e),
                                   lambda si, b: (b, si, 0)),
        ),
        compiler_params=pltpu.CompilerParams(
            dimension_semantics=("parallel", "parallel"),
            vmem_limit_bytes=vmem_limit,
        ),
    )(x_bf16, w_qkv_t)


# --------------------------------------------------------------------------- stage 2

def _flash_attn_kernel(q_ref, k_ref, v_ref, wo_ref, o_ref,
                       m_ref, l_ref, acc_ref, *, q_block, kv_block, n_heads):
    """grid = (q-block, batch, kv-block); kv is the innermost (flash) reduction.

    q_ref  : (H, tq, hs)  bf16 queries for this q-block (scale already folded in)
    k_ref  : (H, tk, hs)  bf16 keys for this kv-block
    v_ref  : (H, tk, hs)  bf16 values for this kv-block
    wo_ref : (H, hs, E)   bf16 W_out^T split per head
    o_ref  : (tq, E)      output block (written at the last kv step)
    m_ref/l_ref/acc_ref : f32 online-softmax state, persist across kv steps
    """
    qi = pl.program_id(0)
    kv = pl.program_id(2)
    n_kv = pl.num_programs(2)

    @pl.when(kv == 0)
    def _():
        m_ref[...] = jnp.full_like(m_ref, -jnp.inf)
        l_ref[...] = jnp.zeros_like(l_ref)
        acc_ref[...] = jnp.zeros_like(acc_ref)

    # Causal skip: this kv block contributes only if its first key index is not
    # past the last query row of this q block.
    @pl.when(kv * kv_block < (qi + 1) * q_block)
    def _():
        q = q_ref[...]                                    # (H, tq, hs) bf16
        k = k_ref[...]                                    # (H, tk, hs) bf16
        s = jnp.einsum('hqd,hkd->hqk', q, k,
                       preferred_element_type=jnp.float32)   # (H, tq, tk) f32

        # Causal mask with absolute row/col offsets; large finite fill is NaN-safe.
        row = qi * q_block + lax.broadcasted_iota(jnp.int32, (q_block, kv_block), 0)
        col = kv * kv_block + lax.broadcasted_iota(jnp.int32, (q_block, kv_block), 1)
        s = jnp.where((col > row)[None, :, :], -1e30, s)

        m_prev = m_ref[...]
        m_new = jnp.maximum(m_prev, jnp.max(s, axis=-1, keepdims=True))
        alpha = jnp.exp(m_prev - m_new)
        p = jnp.exp(s - m_new)
        l_ref[...] = alpha * l_ref[...] + jnp.sum(p, axis=-1, keepdims=True)
        acc_ref[...] = alpha * acc_ref[...] + jnp.einsum(
            'hqk,hkd->hqd', p.astype(jnp.bfloat16), v_ref[...],
            preferred_element_type=jnp.float32)
        m_ref[...] = m_new

    @pl.when(kv == n_kv - 1)
    def _():
        # Normalize once at the end; reciprocal runs on the (otherwise idle) EUP.
        ctx = acc_ref[...] * pl.reciprocal(l_ref[...], approx=True)   # (H, tq, hs) f32
        e_out = o_ref.shape[-1]
        out = jnp.zeros((q_block, e_out), jnp.float32)
        # Fused output projection:  sum_h ctx_h @ W_out[:, h*hs:(h+1)*hs]^T
        for h in range(n_heads):
            out = out + jnp.dot(ctx[h].astype(jnp.bfloat16), wo_ref[h],
                                preferred_element_type=jnp.float32)
        o_ref[...] = out.astype(o_ref.dtype)


# --------------------------------------------------------------------------- wrappers

def prepare_mhsa_weights(w_qkv, w_out, *, n_heads):
    """One-time weight prep (outside the hot path).

    w_qkv: (3E, E) torch nn.Linear layout (out_features, in_features), no bias
    w_out: (E, E)  torch layout
    Returns:
      w_qkv_t: (E, 3E) bf16, transposed once, 1/sqrt(hs) folded into the Q columns
      wo_r   : (H, hs, E) bf16, W_out^T split per head
    """
    three_e, e = w_qkv.shape
    hs = e // n_heads
    assert hs * n_heads == e and three_e == 3 * e
    scale = 1.0 / math.sqrt(hs)
    w_qkv = jnp.asarray(w_qkv, jnp.float32)
    w_qkv_scaled = jnp.concatenate([w_qkv[:e] * scale, w_qkv[e:]], axis=0)
    w_qkv_t = w_qkv_scaled.T.astype(jnp.bfloat16)                       # (E, 3E)
    wo_r = jnp.asarray(w_out, jnp.float32).T.reshape(n_heads, hs, e)    # (H, hs, E)
    return w_qkv_t, wo_r.astype(jnp.bfloat16)


def multi_head_self_attention(x, w_qkv_t, wo_r, *, q_block=None, kv_block=None):
    """x: (N, S, E) float32; w_qkv_t / wo_r from prepare_mhsa_weights."""
    N, S, E = x.shape
    H, hs, e_in = wo_r.shape
    assert e_in == E and H * hs == E and w_qkv_t.shape == (E, 3 * E)

    vmem_limit = _vmem_limit_bytes()
    s_block = _choose_block(S)
    if q_block is None:
        q_block = _choose_block(S, candidates=(256, 128))
    if kv_block is None:
        kv_block = _choose_block(S, candidates=(256, 128))
    num_q, num_kv = S // q_block, S // kv_block
    assert num_q * q_block == S and num_kv * kv_block == S

    # Single cast at the boundary; every MXU input downstream is bf16.
    x_bf16 = x.astype(jnp.bfloat16)

    # Stage 1: QKV projection for all heads at once (K/V computed exactly once).
    qkv = _qkv_projection(x_bf16, w_qkv_t, s_block=s_block, vmem_limit=vmem_limit)

    # Head split: pure layout plumbing on the bf16 intermediate, done once by XLA.
    qkv = qkv.reshape(N, S, 3, H, hs).transpose(2, 0, 3, 1, 4)   # (3, N, H, S, hs)
    q, k, v = qkv[0], qkv[1], qkv[2]

    kernel = functools.partial(_flash_attn_kernel, q_block=q_block,
                               kv_block=kv_block, n_heads=H)

    # Stage 2: flash attention + fused output projection.
    return pl.pallas_call(
        kernel,
        out_shape=jax.ShapeDtypeStruct((N, S, E), x.dtype),
        grid_spec=pltpu.PrefetchScalarGridSpec(
            num_scalar_prefetch=0,
            # q-block axis leading (good 2-TC sharding even at batch 1-2);
            # kv reduction innermost so the online-softmax scratch is valid.
            grid=(num_q, N, num_kv),
            in_specs=[
                pl.BlockSpec((pl.Squeezed(), H, q_block, hs),
                             lambda qi, b, kv: (b, 0, qi, 0)),
                pl.BlockSpec((pl.Squeezed(), H, kv_block, hs),
                             lambda qi, b, kv: (b, 0, kv, 0)),
                pl.BlockSpec((pl.Squeezed(), H, kv_block, hs),
                             lambda qi, b, kv: (b, 0, kv, 0)),
                pl.BlockSpec((H, hs, E), lambda qi, b, kv: (0, 0, 0)),
            ],
            out_specs=pl.BlockSpec((pl.Squeezed(), q_block, E),
                                   lambda qi, b, kv: (b, qi, 0)),
            scratch_shapes=[
                pltpu.VMEM((H, q_block, 1), jnp.float32),    # running max   m
                pltpu.VMEM((H, q_block, 1), jnp.float32),    # running denom l
                pltpu.VMEM((H, q_block, hs), jnp.float32),   # running context
            ],
        ),
        compiler_params=pltpu.CompilerParams(
            dimension_semantics=("parallel", "parallel", "arbitrary"),
            vmem_limit_bytes=vmem_limit,
        ),
    )(q, k, v, wo_r)


# --------------------------------------------------------------------------- reference

def _reference(x, w_qkv, w_out, *, n_heads):
    """Pure-JAX f32 reference mirroring the PyTorch forward exactly."""
    N, S, E = x.shape
    hs = E // n_heads
    qkv = x @ w_qkv.T                                               # (N, S, 3E)
    q, k, v = jnp.split(qkv, 3, axis=2)

    def to_heads(t):
        return t.reshape(N, S, n_heads, hs).transpose(0, 2, 1, 3)   # (N, H, S, hs)

    q, k, v = to_heads(q), to_heads(k), to_heads(v)
    logits = (q @ k.transpose(0, 1, 3, 2)) / math.sqrt(hs)          # (N, H, S, S)
    mask = jnp.triu(jnp.ones((S, S), dtype=bool), k=1)[None, None]
    logits = jnp.where(mask, -jnp.inf, logits)
    attn = jax.nn.softmax(logits, axis=-1)
    ctx = attn @ v                                                  # (N, H, S, hs)
    ctx = ctx.transpose(0, 2, 1, 3).reshape(N, S, E)
    return ctx @ w_out.T


if __name__ == "__main__":
    # Small shapes consistent with the module's forward.
    N, S, E, H = 2, 8, 32, 4

    key = jax.random.PRNGKey(0)
    kx, kq, ko = jax.random.split(key, 3)

    x = jax.random.normal(kx, (N, S, E), dtype=jnp.float32)
    # Deterministic "Linear" weights, torch layout (out_features, in_features), no bias.
    bound = 1.0 / math.sqrt(E)
    w_qkv = jax.random.uniform(kq, (3 * E, E), minval=-bound, maxval=bound, dtype=jnp.float32)
    w_out = jax.random.uniform(ko, (E, E), minval=-bound, maxval=bound, dtype=jnp.float32)

    # One-time weight prep (bf16, transpose, scale fold) outside the hot path.
    w_qkv_t, wo_r = prepare_mhsa_weights(w_qkv, w_out, n_heads=H)

    out = multi_head_self_attention(x, w_qkv_t, wo_r)
    out = jax.block_until_ready(out)

    ref = _reference(x, w_qkv, w_out, n_heads=H)
    assert out.shape == (N, S, E)
    # bf16 MXU inputs with f32 accumulation => bf16-appropriate tolerance vs f32 ref.
    assert jnp.allclose(out, ref, atol=5e-2, rtol=5e-2), "mismatch vs reference"

    print("KERNEL_OK")
</pallas_src>

<mosaic_0001>
module attributes {stable_mosaic.version = 11 : i64} {
  func.func @_qkv_proj_kernel(%arg0: i32, %arg1: i32, %arg2: memref<1x8x32xbf16, #tpu.memory_space<vmem>>, %arg3: memref<32x96xbf16, #tpu.memory_space<vmem>>, %arg4: memref<1x8x96xbf16, #tpu.memory_space<vmem>>) attributes {dimension_semantics = [#tpu.dimension_semantics<parallel>, #tpu.dimension_semantics<parallel>], iteration_bounds = array<i64: 1, 2>, scalar_prefetch = 0 : i64, scratch_operands = 0 : i64, tpu.core_type = #tpu.core_type<tc>, window_params = [{transform_indices = @transform_0, window_bounds = array<i64: 1, 8, 32>}, {pipeline_mode = #tpu.pipeline_mode<synchronous>, transform_indices = @transform_1, window_bounds = array<i64: 32, 96>}, {transform_indices = @transform_2, window_bounds = array<i64: 1, 8, 96>}]} {
    %c0 = arith.constant 0 : index
    %c0_0 = arith.constant 0 : index
    %c0_1 = arith.constant 0 : index
    %0 = vector.load %arg2[%c0, %c0_0, %c0_1] : memref<1x8x32xbf16, #tpu.memory_space<vmem>>, vector<1x8x32xbf16>
    %1 = vector.shape_cast %0 : vector<1x8x32xbf16> to vector<8x32xbf16>
    %c0_2 = arith.constant 0 : index
    %c0_3 = arith.constant 0 : index
    %2 = vector.load %arg3[%c0_2, %c0_3] : memref<32x96xbf16, #tpu.memory_space<vmem>>, vector<32x96xbf16>
    %cst = arith.constant dense<0.000000e+00> : vector<8x96xf32>
    %3 = tpu.matmul %1, %2, %cst {dimension_numbers = #tpu.dot_dimension_numbers<[1], [0], [0], [1], [0, 0, 1, 1], [], []>} : vector<8x32xbf16>, vector<32x96xbf16>, vector<8x96xf32> -> vector<8x96xf32>
    %4 = arith.truncf %3 : vector<8x96xf32> to vector<8x96xbf16>
    %c0_4 = arith.constant 0 : index
    %c0_5 = arith.constant 0 : index
    %c0_6 = arith.constant 0 : index
    %5 = vector.load %arg4[%c0_4, %c0_5, %c0_6] : memref<1x8x96xbf16, #tpu.memory_space<vmem>>, vector<1x8x96xbf16>
    %6 = vector.shape_cast %5 : vector<1x8x96xbf16> to vector<8x96xbf16>
    %7 = vector.shape_cast %4 : vector<8x96xbf16> to vector<1x8x96xbf16>
    tpu.vector_store %arg4[%c0_4, %c0_5, %c0_6], %7 {strides = array<i32>} : memref<1x8x96xbf16, #tpu.memory_space<vmem>>, vector<1x8x96xbf16>,
    return
  }
  func.func @transform_0(%arg0: i32, %arg1: i32) -> (i32, i32, i32) {
    %c0_i32 = arith.constant 0 : i32
    %c0_i32_0 = arith.constant 0 : i32
    return %arg1, %arg0, %c0_i32 : i32, i32, i32
  }
  func.func @transform_1(%arg0: i32, %arg1: i32) -> (i32, i32) {
    %c0_i32 = arith.constant 0 : i32
    %c0_i32_0 = arith.constant 0 : i32
    %c0_i32_1 = arith.constant 0 : i32
    return %c0_i32, %c0_i32_0 : i32, i32
  }
  func.func @transform_2(%arg0: i32, %arg1: i32) -> (i32, i32, i32) {
    %c0_i32 = arith.constant 0 : i32
    %c0_i32_0 = arith.constant 0 : i32
    return %arg1, %arg0, %c0_i32 : i32, i32, i32
  }
}

</mosaic_0001>

<bundles_post_ra>
// kernel: tpu_custom_call.1
= control target key start
LH: loop header
LB: loop body
LE: loop exit
PB: predicated region body
PF: predicated region fallthrough
CT: control target
= control target key end

     0   :  { %7 = vsyncpa [#allocation3], 0  ;;  %s851_s0 = inlined_call_operand.hbm [shape: bf16[2,8,32], index: 0, kind: input, shape index: {}]   ;;  %s852_s1 = inlined_call_operand.hbm [shape: bf16[32,96], index: 1, kind: input, shape index: {}]   ;;  %s853_s2 = inlined_call_operand.hbm [shape: bf16[2,8,96], index: 2, kind: output, shape index: {}]  }
   0x1   :  { %9 = vsyncpa [#allocation3 + $0x1], 0 }
   0x2   :  { %10 = vsyncpa [#allocation6], 0 }
   0x3   :  { %11 = vsyncpa [#allocation4], 0 }
   0x4   :  { %13 = vsyncpa [#allocation4 + $0x1], 0  ;;  %s637_s9 = smov 0   ;;  %s639_s10 = smov 0  }
   0x5   :  { %s641_s11 = smov 0   ;;  %s643_s12 = smov 0  }
   0x6   :  { %s645_s13 = smov 0   ;;  %s647_s14 = smov 0  }
   0x7 LB: > { %s361_s15 = sadd.s32 4294967295, %s613_s14   ;;  %s362_s16 = sadd.s32 4294967294, %s613_s14   ;;  %s613_s14 = sphi %s647_s14, %s19_s14   ;;  %s609_s13 = sphi %s645_s13, %s877_s13   ;;  %s605_s12 = sphi %s643_s12, %s876_s12   ;;  %s601_s11 = sphi %s641_s11, %s875_s11   ;;  %s597_s10 = sphi %s639_s10, %s874_s10   ;;  %s593_s9 = sphi %s637_s9, %s873_s9  }
   0x8   : > { %p53_p0 = scmp.ne.s32.totalorder %s597_s10, %s593_s9  ;;  %p671_p1 = scmp.eq.s32.totalorder %s361_s15, 0 }
   0x9   : > { %p675_p2 = scmp.eq.s32.totalorder %s361_s15, 1  ;;  %p106_p3 = scmp.eq.s32.totalorder %s362_s16, 1 }
   0xa   : > { %s858_s17 = scalar_select %p671_p1, 1, 0 }
   0xb   : > { %s859_s18 = scalar_select %p675_p2, 1, 0 }
   0xc   : > { %p681_p4 = por %p671_p1, %p53_p0  ;;  %p363_p5 = scmp.ge.s32.totalorder %s613_s14, 1 }
   0xd   : > { %p686_p6 = por %p106_p3, %p53_p0  ;;  %p113_p7 = scmp.lt.s32.totalorder %s613_s14, 3 }
   0xe   : > { %s860_s19 = scalar_select %p681_p4, 1, 0 }
   0xf   : > { %s861_s20 = scalar_select %p686_p6, 1, 0 }
  0x10   : > { %p691_p8 = pnand %p363_p5, %p113_p7  ;;  %s615_s22 = smov [#allocation5]  }
  0x11   : > { %s125_s23 = sshll.u32 %s615_s22, 4  ;;  %s28_s25 = sadd.s32 1, %s609_s13  ;;  %s126_s23 = int_to_ptr.vmem [resolvable:$true] %s125_s23 }
  0x12   : > { %s862_s21 = scalar_select %p691_p8, 1, 0 }
  0x13   : > { %p398_p9 = pneg %p691_p8  ;;  %s469_s28 = scalar_lea.hbm %s852_s1, 256 }
  0x14   : > { %p470_p12 = scmp.ne.s32.totalorder %s852_s1, %s469_s28  ;;  %p476_p5 = scmp.lt.u32.totalorder %s469_s28, %s852_s1 }
  0x15   : > { %p700_p11 = pnand %p398_p9, %p671_p1 }
  0x17   : > { %p471_p13 = pneg %p700_p11 }
  0x19   : > { %p472_p0 = pnand %p471_p13, %p470_p12 }
  0x1b   : > { %p473_p3 = pneg %p472_p0 }
  0x1d   : > { %p478_p7 = pnand %p476_p5, %p473_p3 }
  0x1f   : > { %481 = shalt.err (!%p478_p7)
}
  0x20   : > { %s482_s5 = scalar_lea.vmem %s126_s23, 256  ;;  %p490_p1 = scmp.lt.s32.totalorder %s126_s23, %s126_s23 }
  0x21   : > { %p483_p9 = scmp.ne.s32.totalorder %s126_s23, %s482_s5  ;;  %p491_p4 = scmp.lt.s32.totalorder %s482_s5, %s482_s5 }
  0x23   : > { %p485_p10 = pnand %p483_p9, %p471_p13  ;;  %p492_p8 = por %p491_p4, %p490_p1 }
  0x25   : > { %p486_p6 = pneg %p485_p10 }
  0x27   : > { %p493_p2 = pnand %p492_p8, %p486_p6 }
  0x29   : > { %496 = shalt.err (!%p493_p2)
}
  0x2a   : > { %s616_s6 = smov 64   ;;  %s617_s7 = smov 4  }
  0x2b   : > { %401 = dma.hbm_to_vmem [thread:$0]  (!%p700_p11), %s852_s1, 256, %s126_s23, [#allocation6], %s616_s6, %s616_s6, %s617_s7  }
  0x2c   : > { %p29_p1 = scmp.ge.s32.totalorder %s28_s25, 2  ;;  %s40_s16 = sadd.s32 1, %s601_s11 }
  0x2d   : > { %p47_p2 = scmp.ne.s32.totalorder %s601_s11, %s597_s10  ;;  %p48_p4 = scmp.eq.s32.totalorder %s613_s14, 0 }
  0x2e   : > { %s879_s25 = smov (%p29_p1, %s28_s25), 0  ;;  %p865_p8 = scmp.ne.s32.totalorder %s859_s18, 0 }
  0x2f   : > { %p727_p6 = por %p48_p4, %p47_p2  ;;  %s35_s24 = ssub.s32 %s609_s13, %s879_s25 }
  0x30   : > { %p733_p10 = por %p865_p8, %p47_p2  ;;  %p411_p12 = scmp.lt.s32.totalorder %s613_s14, 2 }
  0x31   : > { %p38_p11 = scmp.eq.s32.totalorder %s35_s24, 0  ;;  %s139_s23 = sand.u32 1, %s601_s11  }
  0x32   : > { %s366_s27 = sshll.u32 %s139_s23, 2  ;;  %s367_s29 = sshll.u32 %s609_s13, 6 }
  0x33   : > { %s742_s28 = scalar_select %p38_p11, %s601_s11, %s40_s16  }
  0x34   : > { %s748_s4 = scalar_lea.hbm %s851_s0, %s367_s29  ;;  %s143_s18 = scalar_lea.vmem [#allocation2], %s366_s27 }
  0x35   : > { %s151_s5 = sshll.u32 %s143_s18, 4  ;;  %p754_p13 = pnand %p411_p12, %p727_p6  ;;  %s750_s5 = int_to_ptr.vmem [resolvable:$true] %s151_s5 }
  0x36   : > { %s140_s7 = scalar_lea.sflag [#allocation3], %s139_s23  ;;  %s497_s8 = scalar_lea.hbm %s748_s4, 64 }
  0x37   : > { %p498_p0 = scmp.ne.s32.totalorder %s748_s4, %s497_s8  ;;  %p499_p3 = pneg %p754_p13 }
  0x38   : > { %s502_s24 = scalar_lea.hbm %s851_s0, 128  ;;  %p503_p9 = scmp.lt.u32.totalorder %s748_s4, %s851_s0 }
  0x39   : > { %p500_p5 = pnand %p499_p3, %p498_p0  ;;  %p504_p1 = scmp.lt.u32.totalorder %s502_s24, %s497_s8 }
  0x3a   : > { %p506_p4 = scmp.lt.u32.totalorder %s497_s8, %s748_s4 }
  0x3b   : > { %p501_p7 = pneg %p500_p5  ;;  %p505_p2 = por %p504_p1, %p503_p9 }
  0x3d   : > { %p507_p6 = por %p506_p4, %p505_p2 }
  0x3f   : > { %p508_p8 = pnand %p507_p6, %p501_p7 }
  0x41   : > { %511 = shalt.err (!%p508_p8)
}
  0x42   : > { %s512_s23 = scalar_lea.vmem %s750_s5, 64  ;;  %s618_s29 = smov [#allocation2]  }
  0x43   : > { %p513_p12 = scmp.ne.s32.totalorder %s750_s5, %s512_s23  ;;  %s517_s30 = sshll.u32 %s618_s29, 4  ;;  %s518_s30 = int_to_ptr.vmem [resolvable:$false] %s517_s30 }
  0x44   : > { %s519_s3 = scalar_lea.vmem %s518_s30, 128  ;;  %p520_p5 = scmp.lt.s32.totalorder %s750_s5, %s518_s30 }
  0x45   : > { %p515_p11 = pnand %p513_p12, %p499_p3  ;;  %p521_p9 = scmp.lt.s32.totalorder %s519_s3, %s512_s23 }
  0x47   : > { %p516_p0 = pneg %p515_p11  ;;  %p522_p1 = por %p521_p9, %p520_p5 }
  0x49   : > { %p523_p2 = pnand %p522_p1, %p516_p0 }
  0x4b   : > { %526 = shalt.err (!%p523_p2)
}
  0x4c   : > { %405 = dma.hbm_to_vmem [thread:$0]  (!%p754_p13), %s748_s4, 64, %s750_s5, %s140_s7  }
  0x4d   : > { %p868_p7 = scmp.ne.s32.totalorder %s862_s21, 0 }
  0x4e   : > { %s786_s18 = sand.u32 (!%p868_p7), 1, %s597_s10   ;;  %p869_p3 = scmp.ne.s32.totalorder (!%p868_p7), %s860_s19, 0 }
  0x4f   : > { %160 = sbr.rel (%p868_p7) target bundleno = 327 (0x147), region = 28  ;;  %s369_s8 = sshll.u32 (!%p868_p7), %s786_s18, 2 }
  0x50   : > { %s163_s15 = scalar_lea.sflag (!%p868_p7), [#allocation3], %s786_s18  ;;  %s166_s16 = scalar_lea.vmem (!%p868_p7), [#allocation2], %s369_s8 }
  0x56   : > { %580 = dma.done.wait (%p869_p3), %s163_s15, 64  }
  0x57   : > { %582 = vsyncadd (%p869_p3), %s163_s15, 4294967232  ;;  %p870_p4 = scmp.ne.s32.totalorder %s858_s17, 0 }
  0x59   : > { %584 = dma.done.wait (%p870_p4), [#allocation6], 256  }
  0x5a   : > { %586 = vsyncadd (%p870_p4), [#allocation6], 4294967040  ;;  %v619_v0 = vmov 0.0   ;;  %vm620_vm0 = vmmov 0   ;;  %v467_v1 = vld [vmem:[#allocation5] sm:$0xff]   ;;  %v468_v2 = vld [vmem:[#allocation5 + $0x8] sm:$0xff]  }
  0x5b   : > { %382 = vmatprep.subr.bf16.mxu0 %v619_v0  ;;  %386 = vmatprep.mubr.msk.bf16.mxu0 %vm620_vm0, %v619_v0  ;;  %v192_v3 = vld [vmem:[%s166_s16] sm:$0xf]  ;;  %vm209_vm1 = vcmask 261120   ;;  %s376_s19 = sshll.u32 %s605_s12, 6  ;;  %s190_s21 = scalar_lea.vmem [#allocation7], %s369_s8  ;;  %vm254_vm2 = vcmask 781312  }
  0x5c   : > { %383 = vmatpush3.bf16.msra.mxu0 %v467_v1  ;;  %s271_s4 = sshll.u32 %s190_s21, 4  ;;  %s802_s6 = scalar_lea.hbm %s853_s2, %s376_s19  ;;  %s804_s4 = int_to_ptr.vmem [resolvable:$true] %s271_s4 }
  0x5d   : > { %384 = vmatprep.subr.bf16.mxu0 %v619_v0  ;;  %s257_s12 = scalar_lea.sflag [#allocation4], %s786_s18  ;;  %s527_s7 = scalar_lea.vmem %s804_s4, 64 }
  0x5e   : > { %p528_p13 = scmp.ne.s32.totalorder %s804_s4, %s527_s7  ;;  %s621_s24 = smov [#allocation7]  }
  0x5f   : > { %s531_s22 = sshll.u32 %s621_s24, 4  ;;  %s532_s22 = int_to_ptr.vmem [resolvable:$false] %s531_s22 }
  0x60   : > { %385 = vmatpush3.bf16.msra.mxu0 %v468_v2  ;;  %p529_p6 = pnand %p528_p13, %p733_p10  ;;  %s533_s27 = scalar_lea.vmem %s532_s22, 128 }
  0x61   : > { %p534_p12 = scmp.lt.s32.totalorder %s804_s4, %s532_s22  ;;  %p535_p11 = scmp.lt.s32.totalorder %s533_s27, %s527_s7 }
  0x62   : > { %p530_p8 = pneg %p529_p6 }
  0x63   : > { %387 = vmatmul.mubr.msk.bf16.vlgmr.msra.gmra.mrb[0].mxu0 %vm209_vm1, %v192_v3  ;;  %p536_p0 = por %p535_p11, %p534_p12 }
  0x65   : > { %p537_p5 = pnand %p536_p0, %p530_p8 }
 0x136   : > { %v247_v4 = vpop.f32.mrb[0].mxu0 }
 0x137   : > { %v253_v5 = vpack.c.bf16 %v247_v4, %v247_v4  ;;  %v388_v6 = vpop.f32.mrb[1].mxu0 }
 0x138   : > { %v250_v7 = vpop.f32.mrb[2].mxu0 }
 0x139   : > { %v389_v8 = vpop.f32.mrb[3].mxu0  ;;  %255 = vst.msk [vmem:[%s190_s21] sm:$0xf] %vm254_vm2, %v253_v5 }
 0x13a   : > { %540 = shalt.err (!%p537_p5)
}
 0x13b   : > { %s541_s23 = scalar_lea.hbm %s802_s6, 64  ;;  %s545_s3 = scalar_lea.hbm %s853_s2, 128 }
 0x13c   : > { %p542_p9 = scmp.ne.s32.totalorder %s802_s6, %s541_s23  ;;  %p546_p7 = scmp.lt.u32.totalorder %s802_s6, %s853_s2 }
 0x13d   : > { %p547_p3 = scmp.lt.u32.totalorder %s545_s3, %s541_s23  ;;  %p549_p13 = scmp.lt.u32.totalorder %s541_s23, %s802_s6 }
 0x13e   : > { %p543_p1 = pnand %p542_p9, %p733_p10 }
 0x13f   : > { %p548_p4 = por %p547_p3, %p546_p7 }
 0x140   : > { %p544_p2 = pneg %p543_p1 }
 0x141   : > { %p550_p6 = por %p549_p13, %p548_p4 }
 0x143   : > { %p551_p8 = pnand %p550_p6, %p544_p2 }
 0x145   : > { %554 = shalt.err (!%p551_p8)
}
 0x146   : > { %396 = dma.vmem_to_hbm [thread:$0]  (%p733_p10), %s804_s4, 64, %s802_s6, %s257_s12  }
 0x147 PF: > { %s283_s15 = sand.u32 1, %s593_s9   ;;  %p871_p12 = scmp.ne.s32.totalorder %s861_s20, 0 }
 0x148   : > { %p872_p11 = scmp.ge.s32.totalorder %s613_s14, 2  ;;  %s284_s16 = scalar_lea.sflag [#allocation4], %s283_s15 }
 0x14a   : > { %p407_p0 = pnand %p872_p11, %p871_p12 }
 0x14c   : > { %588 = dma.done.wait (!%p407_p0), %s284_s16, 64  }
 0x14d   : > { %590 = vsyncadd (!%p407_p0), %s284_s16, 4294967232  ;;  %s19_s14 = sadd.s32 1, %s613_s14   ;;  %s873_s9 = smov %s597_s10 }
 0x14e   : > { %p16_p5 = scmp.ge.s32.totalorder %s19_s14, 4   ;;  %s874_s10 = smov %s601_s11 }
 0x14f   : > { %s875_s11 = smov %s742_s28  ;;  %s876_s12 = smov %s609_s13 }
 0x150   : > { %s877_s13 = smov %s879_s25  ;;  %18 = sbr.rel (!%p16_p5) target bundleno = 7 (0x7), region = 77 }
 0x157   :  { %289 = vsyncpa [#allocation3], 1 }
 0x158   :  { %291 = vsyncpa [#allocation3 + $0x1], 1 }
 0x159   :  { %292 = vsyncpa [#allocation6], 1 }
 0x15a   :  { %293 = vsyncpa [#allocation4], 1 }
 0x15b   :  { %295 = vsyncpa [#allocation4 + $0x1], 1 }

</bundles_post_ra>
